<compile_context>
chip_gen: v6e
topology: v6e:2x2x1
jax: 0.10.0
libtpu: 0.0.40
codegen_flags: <defaults>
</compile_context>

<pallas_src>
import functools
import jax
import jax.numpy as jnp
from jax.experimental import pallas as pl
from jax.experimental.pallas import tpu as pltpu


# ---------------------------------------------------------------------------
# Tiling helper
# ---------------------------------------------------------------------------

def _choose_tile(dim, target, align):
    """Largest multiple of `align` <= target that divides `dim`; else the full dim."""
    if dim <= target:
        return dim
    t = (min(target, dim) // align) * align
    while t >= align:
        if dim % t == 0:
            return t
        t -= align
    return dim


# ---------------------------------------------------------------------------
# Pallas kernels
# ---------------------------------------------------------------------------

def _attn_res_ln_kernel(qh_ref, kvh_ref, mask_ref, res_ref,
                        wq_ref, wk_ref, wv_ref, wo_ref, bo_ref,
                        g_ref, beta_ref, o_ref, *, dim_head, eps):
    """SelfAttention(q, kv, kv, mask) + output proj + bias, then LayerNorm(out + q).

    One batch element per grid step.  All head contractions are batch-first
    batched matmuls (head-major layout prepared by the wrapper).
    """
    qh = qh_ref[0]            # (H, Lq, D)
    kvh = kvh_ref[0]          # (H, Lk, D)

    # Per-head Q/K/V projections (weights shared across heads, pre-tiled to (H,D,D)).
    qp = jnp.einsum('hqd,hde->hqe', qh, wq_ref[...],
                    preferred_element_type=jnp.float32)            # (H, Lq, D)
    kp = jnp.einsum('hkd,hde->hke', kvh, wk_ref[...],
                    preferred_element_type=jnp.float32)            # (H, Lk, D)
    vp = jnp.einsum('hkd,hde->hke', kvh, wv_ref[...],
                    preferred_element_type=jnp.float32)            # (H, Lk, D)

    # Scores: 'nqhd,nkhd->nhqk' per batch element; no explicit transpose needed.
    energy = jnp.einsum('hqd,hkd->hqk', qp, kp,
                        preferred_element_type=jnp.float32)        # (H, Lq, Lk)
    scale = 1.0 / (float(dim_head) ** 0.5)
    mask = mask_ref[0]                                             # (Lq, Lk)
    energy = jnp.where(mask[None, :, :] != 0, energy * scale, jnp.float32(-1e20))

    # Softmax over keys (f32 statistics; EUP reciprocal).
    m = jnp.max(energy, axis=-1, keepdims=True)
    p = jnp.exp(energy - m)
    attn = p * pl.reciprocal(jnp.sum(p, axis=-1, keepdims=True), approx=True)

    ctx = jnp.einsum('hqk,hkd->hqd', attn, vp,
                     preferred_element_type=jnp.float32)           # (H, Lq, D)

    # Output projection: concat-over-heads folded into per-head partials summed
    # over h (wo pre-reshaped to (H, D, E) in the wrapper) — avoids any in-kernel
    # head->lane relayout.
    partial = jnp.einsum('hqd,hde->hqe', ctx, wo_ref[...],
                         preferred_element_type=jnp.float32)       # (H, Lq, E)
    out = jnp.sum(partial, axis=0) + bo_ref[...]                   # (Lq, E)

    # Fused residual + LayerNorm epilogue.
    y = out + res_ref[0].astype(jnp.float32)
    mean = jnp.mean(y, axis=-1, keepdims=True)
    var = jnp.mean((y - mean) * (y - mean), axis=-1, keepdims=True)
    yn = (y - mean) * jax.lax.rsqrt(var + eps)
    o_ref[0] = (yn * g_ref[...].astype(jnp.float32)
                + beta_ref[...].astype(jnp.float32)).astype(o_ref.dtype)


def _ffn_res_ln_kernel(x_ref, w1_ref, b1_ref, w2_ref, b2_ref, g_ref, beta_ref,
                       o_ref, *, eps):
    """LayerNorm( relu(x @ W1 + b1) @ W2 + b2 + x ) for one row tile."""
    x = x_ref[...]                                                  # (TR, E)
    h = jnp.dot(x, w1_ref[...], preferred_element_type=jnp.float32)
    h = jnp.maximum(h + b1_ref[...].astype(jnp.float32), 0.0)
    y = jnp.dot(h.astype(w2_ref.dtype), w2_ref[...],
                preferred_element_type=jnp.float32)
    y = y + b2_ref[...].astype(jnp.float32) + x.astype(jnp.float32)
    mean = jnp.mean(y, axis=-1, keepdims=True)
    var = jnp.mean((y - mean) * (y - mean), axis=-1, keepdims=True)
    yn = (y - mean) * jax.lax.rsqrt(var + eps)
    o_ref[...] = (yn * g_ref[...].astype(jnp.float32)
                  + beta_ref[...].astype(jnp.float32)).astype(o_ref.dtype)


def _matmul_bias_kernel(x_ref, w_ref, b_ref, o_ref, acc_ref):
    """K-tiled y = x @ W + b with f32 VMEM accumulator."""
    @pl.when(pl.program_id(2) == 0)
    def _():
        acc_ref[...] = jnp.zeros_like(acc_ref)

    acc_ref[...] += jnp.dot(x_ref[...], w_ref[...],
                            preferred_element_type=jnp.float32)

    @pl.when(pl.program_id(2) == pl.num_programs(2) - 1)
    def _():
        o_ref[...] = (acc_ref[...] + b_ref[...].astype(jnp.float32)).astype(o_ref.dtype)


# ---------------------------------------------------------------------------
# Wrappers (pallas_call setup)
# ---------------------------------------------------------------------------

def attention_res_ln(q, kv, mask, p, gamma, beta, *, heads, dim_head, eps=1e-5):
    """LayerNorm( SelfAttention(q, kv, kv, mask) + q ) — one fused pallas_call."""
    N, Lq, E = q.shape
    Lk = kv.shape[1]
    # Head-major layout prepared in the wrapper (plain XLA ops) so every in-kernel
    # contraction is a batch-first batched matmul with no in-kernel relayout.
    qh = q.reshape(N, Lq, heads, dim_head).transpose(0, 2, 1, 3)
    kvh = kv.reshape(N, Lk, heads, dim_head).transpose(0, 2, 1, 3)
    wq_h = jnp.broadcast_to(p["wq"], (heads, dim_head, dim_head))
    wk_h = jnp.broadcast_to(p["wk"], (heads, dim_head, dim_head))
    wv_h = jnp.broadcast_to(p["wv"], (heads, dim_head, dim_head))
    wo_h = p["wo"].reshape(heads, dim_head, E)

    kern = functools.partial(_attn_res_ln_kernel, dim_head=dim_head, eps=eps)
    return pl.pallas_call(
        kern,
        out_shape=jax.ShapeDtypeStruct((N, Lq, E), q.dtype),
        grid=(N,),
        in_specs=[
            pl.BlockSpec((1, heads, Lq, dim_head), lambda n: (n, 0, 0, 0)),
            pl.BlockSpec((1, heads, Lk, dim_head), lambda n: (n, 0, 0, 0)),
            pl.BlockSpec((1, Lq, Lk), lambda n: (n, 0, 0)),
            pl.BlockSpec((1, Lq, E), lambda n: (n, 0, 0)),
            pl.BlockSpec((heads, dim_head, dim_head), lambda n: (0, 0, 0)),
            pl.BlockSpec((heads, dim_head, dim_head), lambda n: (0, 0, 0)),
            pl.BlockSpec((heads, dim_head, dim_head), lambda n: (0, 0, 0)),
            pl.BlockSpec((heads, dim_head, E), lambda n: (0, 0, 0)),
            pl.BlockSpec((1, E), lambda n: (0, 0)),
            pl.BlockSpec((1, E), lambda n: (0, 0)),
            pl.BlockSpec((1, E), lambda n: (0, 0)),
        ],
        out_specs=pl.BlockSpec((1, Lq, E), lambda n: (n, 0, 0)),
        compiler_params=pltpu.CompilerParams(dimension_semantics=("parallel",)),
    )(qh, kvh, mask, q, wq_h, wk_h, wv_h, wo_h,
      p["bo"].reshape(1, E), gamma.reshape(1, E), beta.reshape(1, E))


def ffn_res_ln(x, w1, b1, w2, b2, gamma, beta, eps=1e-5):
    """LayerNorm( FFN(x) + x ), row-tiled over N*L for DMA/compute pipelining."""
    N, L, E = x.shape
    F = w1.shape[1]
    R = N * L
    x2 = x.reshape(R, E)
    TR = _choose_tile(R, 512, 8)
    out = pl.pallas_call(
        functools.partial(_ffn_res_ln_kernel, eps=eps),
        out_shape=jax.ShapeDtypeStruct((R, E), x.dtype),
        grid=(R // TR,),
        in_specs=[
            pl.BlockSpec((TR, E), lambda i: (i, 0)),
            pl.BlockSpec((E, F), lambda i: (0, 0)),
            pl.BlockSpec((1, F), lambda i: (0, 0)),
            pl.BlockSpec((F, E), lambda i: (0, 0)),
            pl.BlockSpec((1, E), lambda i: (0, 0)),
            pl.BlockSpec((1, E), lambda i: (0, 0)),
            pl.BlockSpec((1, E), lambda i: (0, 0)),
        ],
        out_specs=pl.BlockSpec((TR, E), lambda i: (i, 0)),
        compiler_params=pltpu.CompilerParams(dimension_semantics=("parallel",)),
    )(x2, w1, b1.reshape(1, F), w2, b2.reshape(1, E),
      gamma.reshape(1, E), beta.reshape(1, E))
    return out.reshape(N, L, E)


def linear(x2d, w, b, *, tm=256, tn=512, tk=512):
    """Tiled y = x @ W + b (used for the final vocab projection)."""
    R, K = x2d.shape
    Nout = w.shape[1]
    tm = _choose_tile(R, tm, 8)
    tn = _choose_tile(Nout, tn, 128)
    tk = _choose_tile(K, tk, 128)
    return pl.pallas_call(
        _matmul_bias_kernel,
        out_shape=jax.ShapeDtypeStruct((R, Nout), x2d.dtype),
        grid=(R // tm, Nout // tn, K // tk),
        in_specs=[
            pl.BlockSpec((tm, tk), lambda i, j, k: (i, k)),
            pl.BlockSpec((tk, tn), lambda i, j, k: (k, j)),
            pl.BlockSpec((1, tn), lambda i, j, k: (0, j)),
        ],
        out_specs=pl.BlockSpec((tm, tn), lambda i, j, k: (i, j)),
        scratch_shapes=[pltpu.VMEM((tm, tn), jnp.float32)],
        compiler_params=pltpu.CompilerParams(
            dimension_semantics=("parallel", "parallel", "arbitrary")),
    )(x2d, w, b.reshape(1, Nout))


# ---------------------------------------------------------------------------
# Decoder forward (glue: embedding gather + layer loop; compute in kernels)
# ---------------------------------------------------------------------------

def decoder_forward(tokens, enc_out, src_mask, trg_mask, params, *, heads, dim_head):
    N, L = tokens.shape
    E = heads * dim_head
    positions = jnp.arange(L, dtype=jnp.int32)
    # TODO(synk): embedding gather stays in JAX (data-dependent gather).
    out = params["word_emb"][tokens] + params["pos_emb"][positions][None, :, :]
    # dropout: eval mode -> identity

    for lp in params["layers"]:
        # ---- DecoderBlock: masked self-attention + residual + norm (fused) ----
        query = attention_res_ln(out, out, trg_mask, lp["attn1"],
                                 lp["norm_g"], lp["norm_b"],
                                 heads=heads, dim_head=dim_head)
        # ---- TransformerBlock: cross-attention + residual + norm1 (fused) ----
        x = attention_res_ln(query, enc_out, src_mask, lp["attn2"],
                             lp["norm1_g"], lp["norm1_b"],
                             heads=heads, dim_head=dim_head)
        # ---- feed forward + residual + norm2 (fused, row-tiled) ----
        out = ffn_res_ln(x, lp["ff_w1"], lp["ff_b1"], lp["ff_w2"], lp["ff_b2"],
                         lp["norm2_g"], lp["norm2_b"])

    logits = linear(out.reshape(N * L, E), params["fc_w"], params["fc_b"])
    return logits.reshape(N, L, -1)


# ---------------------------------------------------------------------------
# Pure-JAX reference (for numerical sanity check)
# ---------------------------------------------------------------------------

def _ref_attention(q, kv, mask, p, heads, dim_head):
    N, Lq, E = q.shape
    Lk = kv.shape[1]
    qh = q.reshape(N, Lq, heads, dim_head) @ p["wq"]
    kh = kv.reshape(N, Lk, heads, dim_head) @ p["wk"]
    vh = kv.reshape(N, Lk, heads, dim_head) @ p["wv"]
    energy = jnp.einsum("nqhd,nkhd->nhqk", qh, kh)
    energy = jnp.where(mask[:, None, :, :] != 0,
                       energy / jnp.sqrt(float(dim_head)), -1e20)
    attn = jax.nn.softmax(energy, axis=-1)
    o = jnp.einsum("nhqk,nkhd->nqhd", attn, vh).reshape(N, Lq, E)
    return o @ p["wo"] + p["bo"]


def _ref_ln(x, g, b, eps=1e-5):
    m = jnp.mean(x, axis=-1, keepdims=True)
    v = jnp.mean((x - m) ** 2, axis=-1, keepdims=True)
    return (x - m) * jax.lax.rsqrt(v + eps) * g + b


def decoder_forward_ref(tokens, enc_out, src_mask, trg_mask, params, *, heads, dim_head):
    N, L = tokens.shape
    positions = jnp.arange(L, dtype=jnp.int32)
    out = params["word_emb"][tokens] + params["pos_emb"][positions][None, :, :]
    for lp in params["layers"]:
        a = _ref_attention(out, out, trg_mask, lp["attn1"], heads, dim_head)
        query = _ref_ln(a + out, lp["norm_g"], lp["norm_b"])
        a2 = _ref_attention(query, enc_out, src_mask, lp["attn2"], heads, dim_head)
        x = _ref_ln(a2 + query, lp["norm1_g"], lp["norm1_b"])
        h = jnp.maximum(x @ lp["ff_w1"] + lp["ff_b1"], 0.0) @ lp["ff_w2"] + lp["ff_b2"]
        out = _ref_ln(h + x, lp["norm2_g"], lp["norm2_b"])
    return out @ params["fc_w"] + params["fc_b"]


# ---------------------------------------------------------------------------
# Parameter init + main
# ---------------------------------------------------------------------------

def init_params(key, *, vocab, embed, heads, num_layers, fwd_exp, max_len):
    D = embed // heads
    F = fwd_exp * embed

    def nrm(k, shape, s=0.05):
        return (s * jax.random.normal(k, shape)).astype(jnp.float32)

    keys = iter(jax.random.split(key, 8 + num_layers * 32))
    params = {
        "word_emb": nrm(next(keys), (vocab, embed), 1.0),
        "pos_emb": nrm(next(keys), (max_len, embed), 1.0),
        "fc_w": nrm(next(keys), (embed, vocab)),
        "fc_b": nrm(next(keys), (vocab,)),
        "layers": [],
    }
    for _ in range(num_layers):
        def attn_params():
            return {
                "wq": nrm(next(keys), (D, D)),
                "wk": nrm(next(keys), (D, D)),
                "wv": nrm(next(keys), (D, D)),
                "wo": nrm(next(keys), (embed, embed)),
                "bo": nrm(next(keys), (embed,)),
            }
        lp = {
            "attn1": attn_params(),
            "attn2": attn_params(),
            "norm_g": 1.0 + nrm(next(keys), (embed,), 0.01),
            "norm_b": nrm(next(keys), (embed,), 0.01),
            "norm1_g": 1.0 + nrm(next(keys), (embed,), 0.01),
            "norm1_b": nrm(next(keys), (embed,), 0.01),
            "norm2_g": 1.0 + nrm(next(keys), (embed,), 0.01),
            "norm2_b": nrm(next(keys), (embed,), 0.01),
            "ff_w1": nrm(next(keys), (embed, F)),
            "ff_b1": nrm(next(keys), (F,)),
            "ff_w2": nrm(next(keys), (F, embed)),
            "ff_b2": nrm(next(keys), (embed,)),
        }
        params["layers"].append(lp)
    return params


if __name__ == "__main__":
    # Small config
    VOCAB, EMBED, HEADS, LAYERS, FWD_EXP, MAXLEN = 50, 32, 4, 2, 4, 16
    DIM_HEAD = EMBED // HEADS
    N, L_TRG, L_SRC = 2, 8, 8

    key = jax.random.PRNGKey(0)
    k_tok, k_enc, k_par = jax.random.split(key, 3)

    tokens = jax.random.randint(k_tok, (N, L_TRG), 0, VOCAB, dtype=jnp.int32)
    enc_out = jax.random.normal(k_enc, (N, L_SRC, EMBED), dtype=jnp.float32)
    # trg mask: causal [N, Lq, Lq]; src mask: all-ones [N, Lq, Lk]
    trg_mask = jnp.broadcast_to(
        jnp.tril(jnp.ones((L_TRG, L_TRG), jnp.int32)), (N, L_TRG, L_TRG))
    src_mask = jnp.ones((N, L_TRG, L_SRC), jnp.int32)

    params = init_params(k_par, vocab=VOCAB, embed=EMBED, heads=HEADS,
                         num_layers=LAYERS, fwd_exp=FWD_EXP, max_len=MAXLEN)

    logits = decoder_forward(tokens, enc_out, src_mask, trg_mask, params,
                             heads=HEADS, dim_head=DIM_HEAD)
    logits = jax.block_until_ready(logits)

    ref = decoder_forward_ref(tokens, enc_out, src_mask, trg_mask, params,
                              heads=HEADS, dim_head=DIM_HEAD)
    assert logits.shape == (N, L_TRG, VOCAB)
    assert bool(jnp.all(jnp.isfinite(logits)))
    assert bool(jnp.allclose(logits, ref, rtol=2e-2, atol=2e-2)), (
        float(jnp.max(jnp.abs(logits - ref))))
    print("KERNEL_OK")
</pallas_src>

<mosaic_0001>
module attributes {stable_mosaic.version = 11 : i64} {
  func.func @_attn_res_ln_kernel(%arg0: i32, %arg1: memref<1x4x8x8xf32, #tpu.memory_space<vmem>>, %arg2: memref<1x4x8x8xf32, #tpu.memory_space<vmem>>, %arg3: memref<1x8x8xi32, #tpu.memory_space<vmem>>, %arg4: memref<1x8x32xf32, #tpu.memory_space<vmem>>, %arg5: memref<4x8x8xf32, #tpu.memory_space<vmem>>, %arg6: memref<4x8x8xf32, #tpu.memory_space<vmem>>, %arg7: memref<4x8x8xf32, #tpu.memory_space<vmem>>, %arg8: memref<4x8x32xf32, #tpu.memory_space<vmem>>, %arg9: memref<1x32xf32, #tpu.memory_space<vmem>>, %arg10: memref<1x32xf32, #tpu.memory_space<vmem>>, %arg11: memref<1x32xf32, #tpu.memory_space<vmem>>, %arg12: memref<1x8x32xf32, #tpu.memory_space<vmem>>) attributes {dimension_semantics = [#tpu.dimension_semantics<parallel>], iteration_bounds = array<i64: 2>, scalar_prefetch = 0 : i64, scratch_operands = 0 : i64, tpu.core_type = #tpu.core_type<tc>, window_params = [{transform_indices = @transform_0, window_bounds = array<i64: 1, 4, 8, 8>}, {transform_indices = @transform_1, window_bounds = array<i64: 1, 4, 8, 8>}, {transform_indices = @transform_2, window_bounds = array<i64: 1, 8, 8>}, {transform_indices = @transform_3, window_bounds = array<i64: 1, 8, 32>}, {pipeline_mode = #tpu.pipeline_mode<synchronous>, transform_indices = @transform_4, window_bounds = array<i64: 4, 8, 8>}, {pipeline_mode = #tpu.pipeline_mode<synchronous>, transform_indices = @transform_5, window_bounds = array<i64: 4, 8, 8>}, {pipeline_mode = #tpu.pipeline_mode<synchronous>, transform_indices = @transform_6, window_bounds = array<i64: 4, 8, 8>}, {pipeline_mode = #tpu.pipeline_mode<synchronous>, transform_indices = @transform_7, window_bounds = array<i64: 4, 8, 32>}, {pipeline_mode = #tpu.pipeline_mode<synchronous>, transform_indices = @transform_8, window_bounds = array<i64: 1, 32>}, {pipeline_mode = #tpu.pipeline_mode<synchronous>, transform_indices = @transform_9, window_bounds = array<i64: 1, 32>}, {pipeline_mode = #tpu.pipeline_mode<synchronous>, transform_indices = @transform_10, window_bounds = array<i64: 1, 32>}, {transform_indices = @transform_11, window_bounds = array<i64: 1, 8, 32>}]} {
    %c0 = arith.constant 0 : index
    %c0_0 = arith.constant 0 : index
    %c0_1 = arith.constant 0 : index
    %c0_2 = arith.constant 0 : index
    %0 = vector.load %arg1[%c0, %c0_0, %c0_1, %c0_2] : memref<1x4x8x8xf32, #tpu.memory_space<vmem>>, vector<1x4x8x8xf32>
    %1 = vector.shape_cast %0 : vector<1x4x8x8xf32> to vector<4x8x8xf32>
    %c0_3 = arith.constant 0 : index
    %c0_4 = arith.constant 0 : index
    %c0_5 = arith.constant 0 : index
    %c0_6 = arith.constant 0 : index
    %2 = vector.load %arg2[%c0_3, %c0_4, %c0_5, %c0_6] : memref<1x4x8x8xf32, #tpu.memory_space<vmem>>, vector<1x4x8x8xf32>
    %3 = vector.shape_cast %2 : vector<1x4x8x8xf32> to vector<4x8x8xf32>
    %c0_7 = arith.constant 0 : index
    %c0_8 = arith.constant 0 : index
    %c0_9 = arith.constant 0 : index
    %4 = vector.load %arg5[%c0_7, %c0_8, %c0_9] : memref<4x8x8xf32, #tpu.memory_space<vmem>>, vector<4x8x8xf32>
    "tpu.trace_start"() <{level = 10 : i32, message = "hqd,hde->hqe"}> : () -> ()
    %cst = arith.constant dense<0.000000e+00> : vector<4x8x8xf32>
    %5 = tpu.matmul %1, %4, %cst {dimension_numbers = #tpu.dot_dimension_numbers<[2], [1], [1], [2], [0, 0, 0, 1, 1, 2], [0], [0]>} : vector<4x8x8xf32>, vector<4x8x8xf32>, vector<4x8x8xf32> -> vector<4x8x8xf32>
    "tpu.trace_stop"() : () -> ()
    %c0_10 = arith.constant 0 : index
    %c0_11 = arith.constant 0 : index
    %c0_12 = arith.constant 0 : index
    %6 = vector.load %arg6[%c0_10, %c0_11, %c0_12] : memref<4x8x8xf32, #tpu.memory_space<vmem>>, vector<4x8x8xf32>
    "tpu.trace_start"() <{level = 10 : i32, message = "hkd,hde->hke"}> : () -> ()
    %cst_13 = arith.constant dense<0.000000e+00> : vector<4x8x8xf32>
    %7 = tpu.matmul %3, %6, %cst_13 {dimension_numbers = #tpu.dot_dimension_numbers<[2], [1], [1], [2], [0, 0, 0, 1, 1, 2], [0], [0]>} : vector<4x8x8xf32>, vector<4x8x8xf32>, vector<4x8x8xf32> -> vector<4x8x8xf32>
    "tpu.trace_stop"() : () -> ()
    %c0_14 = arith.constant 0 : index
    %c0_15 = arith.constant 0 : index
    %c0_16 = arith.constant 0 : index
    %8 = vector.load %arg7[%c0_14, %c0_15, %c0_16] : memref<4x8x8xf32, #tpu.memory_space<vmem>>, vector<4x8x8xf32>
    "tpu.trace_start"() <{level = 10 : i32, message = "hkd,hde->hke"}> : () -> ()
    %cst_17 = arith.constant dense<0.000000e+00> : vector<4x8x8xf32>
    %9 = tpu.matmul %3, %8, %cst_17 {dimension_numbers = #tpu.dot_dimension_numbers<[2], [1], [1], [2], [0, 0, 0, 1, 1, 2], [0], [0]>} : vector<4x8x8xf32>, vector<4x8x8xf32>, vector<4x8x8xf32> -> vector<4x8x8xf32>
    "tpu.trace_stop"() : () -> ()
    "tpu.trace_start"() <{level = 10 : i32, message = "hqd,hkd->hqk"}> : () -> ()
    %cst_18 = arith.constant dense<0.000000e+00> : vector<4x8x8xf32>
    %10 = tpu.matmul %5, %7, %cst_18 {dimension_numbers = #tpu.dot_dimension_numbers<[2], [2], [1], [1], [0, 0, 0, 1, 1, 1], [0], [0]>} : vector<4x8x8xf32>, vector<4x8x8xf32>, vector<4x8x8xf32> -> vector<4x8x8xf32>
    "tpu.trace_stop"() : () -> ()
    %c0_19 = arith.constant 0 : index
    %c0_20 = arith.constant 0 : index
    %c0_21 = arith.constant 0 : index
    %11 = vector.load %arg3[%c0_19, %c0_20, %c0_21] : memref<1x8x8xi32, #tpu.memory_space<vmem>>, vector<1x8x8xi32>
    %12 = vector.shape_cast %11 : vector<1x8x8xi32> to vector<8x8xi32>
    %13 = vector.shape_cast %12 : vector<8x8xi32> to vector<1x8x8xi32>
    %c0_i32 = arith.constant 0 : i32
    %14 = vector.broadcast %c0_i32 : i32 to vector<1x8x8xi32>
    %15 = arith.cmpi ne, %13, %14 : vector<1x8x8xi32>
    %cst_22 = arith.constant 0.353553385 : f32
    %16 = vector.broadcast %cst_22 : f32 to vector<4x8x8xf32>
    %17 = arith.mulf %10, %16 : vector<4x8x8xf32>
    %cst_23 = arith.constant -1.000000e+20 : f32
    %18 = vector.shape_cast %15 : vector<1x8x8xi1> to vector<1x8x8xi1>
    %19 = vector.broadcast %18 : vector<1x8x8xi1> to vector<4x8x8xi1>
    %20 = vector.broadcast %cst_23 : f32 to vector<4x8x8xf32>
    %21 = arith.select %19, %17, %20 : vector<4x8x8xi1>, vector<4x8x8xf32>
    %cst_24 = arith.constant dense<0xFF800000> : vector<4x8xf32>
    %22 = vector.multi_reduction <maximumf>, %21, %cst_24 [2] : vector<4x8x8xf32> to vector<4x8xf32>
    %23 = vector.shape_cast %22 : vector<4x8xf32> to vector<4x8x1xf32>
    %24 = vector.broadcast %23 : vector<4x8x1xf32> to vector<4x8x8xf32>
    %25 = arith.subf %21, %24 : vector<4x8x8xf32>
    %26 = math.exp %25 : vector<4x8x8xf32>
    %cst_25 = arith.constant dense<0.000000e+00> : vector<4x8xf32>
    %27 = vector.multi_reduction <add>, %26, %cst_25 [2] : vector<4x8x8xf32> to vector<4x8xf32>
    %28 = vector.shape_cast %27 : vector<4x8xf32> to vector<4x8x1xf32>
    %29 = tpu.reciprocal %28 {approx = true} : vector<4x8x1xf32> -> vector<4x8x1xf32>
    %30 = vector.broadcast %29 : vector<4x8x1xf32> to vector<4x8x8xf32>
    %31 = arith.mulf %26, %30 : vector<4x8x8xf32>
    "tpu.trace_start"() <{level = 10 : i32, message = "hqk,hkd->hqd"}> : () -> ()
    %cst_26 = arith.constant dense<0.000000e+00> : vector<4x8x8xf32>
    %32 = tpu.matmul %31, %9, %cst_26 {dimension_numbers = #tpu.dot_dimension_numbers<[2], [1], [1], [2], [0, 0, 0, 1, 1, 2], [0], [0]>} : vector<4x8x8xf32>, vector<4x8x8xf32>, vector<4x8x8xf32> -> vector<4x8x8xf32>
    "tpu.trace_stop"() : () -> ()
    %c0_27 = arith.constant 0 : index
    %c0_28 = arith.constant 0 : index
    %c0_29 = arith.constant 0 : index
    %33 = vector.load %arg8[%c0_27, %c0_28, %c0_29] : memref<4x8x32xf32, #tpu.memory_space<vmem>>, vector<4x8x32xf32>
    "tpu.trace_start"() <{level = 10 : i32, message = "hqd,hde->hqe"}> : () -> ()
    %cst_30 = arith.constant dense<0.000000e+00> : vector<4x8x32xf32>
    %34 = tpu.matmul %32, %33, %cst_30 {dimension_numbers = #tpu.dot_dimension_numbers<[2], [1], [1], [2], [0, 0, 0, 1, 1, 2], [0], [0]>} : vector<4x8x8xf32>, vector<4x8x32xf32>, vector<4x8x32xf32> -> vector<4x8x32xf32>
    "tpu.trace_stop"() : () -> ()
    %cst_31 = arith.constant dense<0.000000e+00> : vector<8x32xf32>
    %35 = vector.multi_reduction <add>, %34, %cst_31 [0] : vector<4x8x32xf32> to vector<8x32xf32>
    %c0_32 = arith.constant 0 : index
    %c0_33 = arith.constant 0 : index
    %36 = vector.load %arg9[%c0_32, %c0_33] : memref<1x32xf32, #tpu.memory_space<vmem>>, vector<1x32xf32>
    %37 = vector.broadcast %36 : vector<1x32xf32> to vector<8x32xf32>
    %38 = arith.addf %35, %37 : vector<8x32xf32>
    %c0_34 = arith.constant 0 : index
    %c0_35 = arith.constant 0 : index
    %c0_36 = arith.constant 0 : index
    %39 = vector.load %arg4[%c0_34, %c0_35, %c0_36] : memref<1x8x32xf32, #tpu.memory_space<vmem>>, vector<1x8x32xf32>
    %40 = vector.shape_cast %39 : vector<1x8x32xf32> to vector<8x32xf32>
    %41 = arith.addf %38, %40 : vector<8x32xf32>
    %cst_37 = arith.constant dense<0.000000e+00> : vector<8xf32>
    %42 = vector.multi_reduction <add>, %41, %cst_37 [1] : vector<8x32xf32> to vector<8xf32>
    %43 = vector.shape_cast %42 : vector<8xf32> to vector<8x1xf32>
    %cst_38 = arith.constant 3.200000e+01 : f32
    %44 = vector.broadcast %cst_38 : f32 to vector<8x1xf32>
    %45 = arith.divf %43, %44 : vector<8x1xf32>
    %46 = vector.broadcast %45 : vector<8x1xf32> to vector<8x32xf32>
    %47 = arith.subf %41, %46 : vector<8x32xf32>
    %48 = vector.broadcast %45 : vector<8x1xf32> to vector<8x32xf32>
    %49 = arith.subf %41, %48 : vector<8x32xf32>
    %50 = arith.mulf %47, %49 : vector<8x32xf32>
    %cst_39 = arith.constant dense<0.000000e+00> : vector<8xf32>
    %51 = vector.multi_reduction <add>, %50, %cst_39 [1] : vector<8x32xf32> to vector<8xf32>
    %52 = vector.shape_cast %51 : vector<8xf32> to vector<8x1xf32>
    %cst_40 = arith.constant 3.200000e+01 : f32
    %53 = vector.broadcast %cst_40 : f32 to vector<8x1xf32>
    %54 = arith.divf %52, %53 : vector<8x1xf32>
    %55 = vector.broadcast %45 : vector<8x1xf32> to vector<8x32xf32>
    %56 = arith.subf %41, %55 : vector<8x32xf32>
    %cst_41 = arith.constant 9.99999974E-6 : f32
    %57 = vector.broadcast %cst_41 : f32 to vector<8x1xf32>
    %58 = arith.addf %54, %57 : vector<8x1xf32>
    %59 = math.rsqrt %58 : vector<8x1xf32>
    %60 = vector.broadcast %59 : vector<8x1xf32> to vector<8x32xf32>
    %61 = arith.mulf %56, %60 : vector<8x32xf32>
    %c0_42 = arith.constant 0 : index
    %c0_43 = arith.constant 0 : index
    %62 = vector.load %arg10[%c0_42, %c0_43] : memref<1x32xf32, #tpu.memory_space<vmem>>, vector<1x32xf32>
    %63 = vector.broadcast %62 : vector<1x32xf32> to vector<8x32xf32>
    %64 = arith.mulf %61, %63 : vector<8x32xf32>
    %c0_44 = arith.constant 0 : index
    %c0_45 = arith.constant 0 : index
    %65 = vector.load %arg11[%c0_44, %c0_45] : memref<1x32xf32, #tpu.memory_space<vmem>>, vector<1x32xf32>
    %66 = vector.broadcast %65 : vector<1x32xf32> to vector<8x32xf32>
    %67 = arith.addf %64, %66 : vector<8x32xf32>
    %c0_46 = arith.constant 0 : index
    %c0_47 = arith.constant 0 : index
    %c0_48 = arith.constant 0 : index
    %68 = vector.load %arg12[%c0_46, %c0_47, %c0_48] : memref<1x8x32xf32, #tpu.memory_space<vmem>>, vector<1x8x32xf32>
    %69 = vector.shape_cast %68 : vector<1x8x32xf32> to vector<8x32xf32>
    %70 = vector.shape_cast %67 : vector<8x32xf32> to vector<1x8x32xf32>
    tpu.vector_store %arg12[%c0_46, %c0_47, %c0_48], %70 {strides = array<i32>} : memref<1x8x32xf32, #tpu.memory_space<vmem>>, vector<1x8x32xf32>,
    return
  }
  func.func @transform_0(%arg0: i32) -> (i32, i32, i32, i32) {
    %c0_i32 = arith.constant 0 : i32
    %c0_i32_0 = arith.constant 0 : i32
    %c0_i32_1 = arith.constant 0 : i32
    %c0_i32_2 = arith.constant 0 : i32
    return %arg0, %c0_i32, %c0_i32_0, %c0_i32_1 : i32, i32, i32, i32
  }
  func.func @transform_1(%arg0: i32) -> (i32, i32, i32, i32) {
    %c0_i32 = arith.constant 0 : i32
    %c0_i32_0 = arith.constant 0 : i32
    %c0_i32_1 = arith.constant 0 : i32
    %c0_i32_2 = arith.constant 0 : i32
    return %arg0, %c0_i32, %c0_i32_0, %c0_i32_1 : i32, i32, i32, i32
  }
  func.func @transform_2(%arg0: i32) -> (i32, i32, i32) {
    %c0_i32 = arith.constant 0 : i32
    %c0_i32_0 = arith.constant 0 : i32
    %c0_i32_1 = arith.constant 0 : i32
    return %arg0, %c0_i32, %c0_i32_0 : i32, i32, i32
  }
  func.func @transform_3(%arg0: i32) -> (i32, i32, i32) {
    %c0_i32 = arith.constant 0 : i32
    %c0_i32_0 = arith.constant 0 : i32
    %c0_i32_1 = arith.constant 0 : i32
    return %arg0, %c0_i32, %c0_i32_0 : i32, i32, i32
  }
  func.func @transform_4(%arg0: i32) -> (i32, i32, i32) {
    %c0_i32 = arith.constant 0 : i32
    %c0_i32_0 = arith.constant 0 : i32
    %c0_i32_1 = arith.constant 0 : i32
    %c0_i32_2 = arith.constant 0 : i32
    return %c0_i32, %c0_i32_0, %c0_i32_1 : i32, i32, i32
  }
  func.func @transform_5(%arg0: i32) -> (i32, i32, i32) {
    %c0_i32 = arith.constant 0 : i32
    %c0_i32_0 = arith.constant 0 : i32
    %c0_i32_1 = arith.constant 0 : i32
    %c0_i32_2 = arith.constant 0 : i32
    return %c0_i32, %c0_i32_0, %c0_i32_1 : i32, i32, i32
  }
  func.func @transform_6(%arg0: i32) -> (i32, i32, i32) {
    %c0_i32 = arith.constant 0 : i32
    %c0_i32_0 = arith.constant 0 : i32
    %c0_i32_1 = arith.constant 0 : i32
    %c0_i32_2 = arith.constant 0 : i32
    return %c0_i32, %c0_i32_0, %c0_i32_1 : i32, i32, i32
  }
  func.func @transform_7(%arg0: i32) -> (i32, i32, i32) {
    %c0_i32 = arith.constant 0 : i32
    %c0_i32_0 = arith.constant 0 : i32
    %c0_i32_1 = arith.constant 0 : i32
    %c0_i32_2 = arith.constant 0 : i32
    return %c0_i32, %c0_i32_0, %c0_i32_1 : i32, i32, i32
  }
  func.func @transform_8(%arg0: i32) -> (i32, i32) {
    %c0_i32 = arith.constant 0 : i32
    %c0_i32_0 = arith.constant 0 : i32
    %c0_i32_1 = arith.constant 0 : i32
    return %c0_i32, %c0_i32_0 : i32, i32
  }
  func.func @transform_9(%arg0: i32) -> (i32, i32) {
    %c0_i32 = arith.constant 0 : i32
    %c0_i32_0 = arith.constant 0 : i32
    %c0_i32_1 = arith.constant 0 : i32
    return %c0_i32, %c0_i32_0 : i32, i32
  }
  func.func @transform_10(%arg0: i32) -> (i32, i32) {
    %c0_i32 = arith.constant 0 : i32
    %c0_i32_0 = arith.constant 0 : i32
    %c0_i32_1 = arith.constant 0 : i32
    return %c0_i32, %c0_i32_0 : i32, i32
  }
  func.func @transform_11(%arg0: i32) -> (i32, i32, i32) {
    %c0_i32 = arith.constant 0 : i32
    %c0_i32_0 = arith.constant 0 : i32
    %c0_i32_1 = arith.constant 0 : i32
    return %arg0, %c0_i32, %c0_i32_0 : i32, i32, i32
  }
}

</mosaic_0001>

<bundles_post_ra>
// kernel: tpu_custom_call.1
= control target key start
LH: loop header
LB: loop body
LE: loop exit
PB: predicated region body
PF: predicated region fallthrough
CT: control target
= control target key end

     0   :  { %s3858_s0 = inlined_call_operand.hbm [shape: f32[2,4,8,8], index: 0, kind: input, shape index: {}]   ;;  %s3859_s1 = inlined_call_operand.hbm [shape: f32[2,4,8,8], index: 1, kind: input, shape index: {}]   ;;  %s3860_s2 = inlined_call_operand.hbm [shape: s32[2,8,8], index: 2, kind: input, shape index: {}]   ;;  %s3861_s3 = inlined_call_operand.hbm [shape: f32[2,8,32], index: 3, kind: input, shape index: {}]   ;;  %s3862_s4 = inlined_call_operand.hbm [shape: f32[4,8,8], index: 4, kind: input, shape index: {}]   ;;  %s3863_s5 = inlined_call_operand.hbm [shape: f32[4,8,8], index: 5, kind: input, shape index: {}]   ;;  %s3864_s6 = inlined_call_operand.hbm [shape: f32[4,8,8], index: 6, kind: input, shape index: {}]   ;;  %s3865_s7 = inlined_call_operand.hbm [shape: f32[4,8,32], index: 7, kind: input, shape index: {}]   ;;  %s3866_s8 = inlined_call_operand.vmem [shape: f32[1,32], index: 8, kind: input, shape index: {}]   ;;  %s3867_s9 = inlined_call_operand.vmem [shape: f32[1,32], index: 9, kind: input, shape index: {}]   ;;  %s3868_s10 = inlined_call_operand.vmem [shape: f32[1,32], index: 10, kind: input, shape index: {}]   ;;  %s3869_s11 = inlined_call_operand.hbm [shape: f32[2,8,32], index: 11, kind: output, shape index: {}]  }
   0x1   :  { %3890 = sst [smem:[#allocation29_spill]] %s3858_s0 }
   0x2   :  { %3891 = sst [smem:[#allocation30_spill]] %s3859_s1 }
   0x3   :  { %3892 = sst [smem:[#allocation31_spill]] %s3862_s4 }
   0x4   :  { %3893 = sst [smem:[#allocation32_spill]] %s3863_s5 }
   0x5   :  { %3894 = sst [smem:[#allocation33_spill]] %s3864_s6 }
   0x6   :  { %3895 = sst [smem:[#allocation34_spill]] %s3865_s7 }
   0x7   :  { %3896 = sst [smem:[#allocation35_spill]] %s3869_s11 }
   0x8   :  { %16 = vsyncpa [#allocation3], 0 }
   0x9   :  { %18 = vsyncpa [#allocation3 + $0x1], 0 }
   0xa   :  { %19 = vsyncpa [#allocation6], 0 }
   0xb   :  { %21 = vsyncpa [#allocation6 + $0x1], 0 }
   0xc   :  { %22 = vsyncpa [#allocation9], 0 }
   0xd   :  { %24 = vsyncpa [#allocation9 + $0x1], 0 }
   0xe   :  { %25 = vsyncpa [#allocation12], 0 }
   0xf   :  { %26 = vsyncpa [#allocation15], 0 }
  0x10   :  { %27 = vsyncpa [#allocation4], 0 }
  0x11   :  { %29 = vsyncpa [#allocation4 + $0x1], 0  ;;  %s3375_s17 = smov 0   ;;  %s3377_s18 = smov 0  }
  0x12   :  { %s3379_s19 = smov 0   ;;  %s3381_s20 = smov 0  }
  0x13 LB: > { %3897 = sst [smem:[#allocation24_spill]] %s3288_s17  ;;  %s3396_s21 = sadd.s32 4294967295, %s3300_s20   ;;  %s3300_s20 = sphi %s3381_s20, %s3937_s20   ;;  %s3296_s19 = sphi %s3379_s19, %s3939_s19   ;;  %s3292_s18 = sphi %s3377_s18, %s3941_s18   ;;  %s3288_s17 = sphi %s3375_s17, %s3940_s17  }
  0x14   : > { %3898 = sst [smem:[#allocation25_spill]] %s3296_s19  ;;  %s2644_s22 = sadd.s32 4294967294, %s3300_s20  }
  0x15   : > { %p55_p0 = scmp.ne.s32.totalorder %s3292_s18, %s3288_s17  ;;  %p3881_p1 = scmp.eq.s32.totalorder %s3396_s21, 0 }
  0x16   : > { %p304_p2 = scmp.eq.s32.totalorder %s3396_s21, 1  ;;  %p310_p3 = scmp.eq.s32.totalorder %s2644_s22, 1 }
  0x17   : > { %p3405_p4 = por %p3881_p1, %p55_p0  ;;  %p2645_p5 = scmp.ge.s32.totalorder %s3300_s20, 1 }
  0x18   : > { %p3410_p6 = por %p310_p3, %p55_p0  ;;  %p317_p7 = scmp.lt.s32.totalorder %s3300_s20, 3 }
  0x19   : > { %s3899_s23 = scalar_select %p3405_p4, 1, 0 }
  0x1a   : > { %s3900_s24 = scalar_select %p3410_p6, 1, 0 }
  0x1b   : > { %p3415_p8 = pnand %p2645_p5, %p317_p7  ;;  %s3302_s26 = smov [#allocation10]  }
  0x1c   : > { %3901 = sst [smem:[#allocation26_spill]] %s3900_s24  ;;  %s329_s27 = sshll.u32 %s3302_s26, 4  ;;  %s330_s27 = int_to_ptr.vmem [resolvable:$true] %s329_s27 }
  0x1d   : > { %s3902_s25 = scalar_select %p3415_p8, 1, 0 }
  0x1e   : > { %p2902_p9 = pneg %p3415_p8  ;;  %s3303_s29 = smov [#allocation11]  }
  0x1f   : > { %s342_s30 = sshll.u32 %s3303_s29, 4  ;;  %s3011_s12 = scalar_lea.vmem %s330_s27, 512  ;;  %s343_s30 = int_to_ptr.vmem [resolvable:$true] %s342_s30 }
  0x20   : > { %p3424_p11 = pnand %p2902_p9, %p3881_p1  ;;  %p3012_p13 = scmp.ne.s32.totalorder %s330_s27, %s3011_s12 }
  0x21   : > { %p3019_p5 = scmp.lt.s32.totalorder %s330_s27, %s330_s27  ;;  %p3020_p7 = scmp.lt.s32.totalorder %s3011_s12, %s3011_s12 }
  0x22   : > { %s3903_s28 = scalar_select %p3424_p11, 1, 0 }
  0x23   : > { %p3882_p12 = pneg %p3424_p11  ;;  %p3021_p10 = por %p3020_p7, %p3019_p5 }
  0x25   : > { %p3014_p0 = pnand %p3012_p13, %p3882_p12 }
  0x27   : > { %p3015_p3 = pneg %p3014_p0 }
  0x29   : > { %p3022_p9 = pnand %p3021_p10, %p3015_p3 }
  0x2b   : > { %3025 = shalt.err (!%p3022_p9)
}
  0x2c   : > { %s3870_s13 = smov 128   ;;  %s3872_s14 = smov 8  }
  0x2d   : > { %s3904_s4 = sld [smem:[#allocation31_spill]]  ;;  %s3037_s22 = scalar_lea.vmem %s343_s30, 512 }
  0x2e   : > { %p3038_p13 = scmp.ne.s32.totalorder %s343_s30, %s3037_s22  ;;  %p3045_p10 = scmp.lt.s32.totalorder %s343_s30, %s343_s30 }
  0x2f   : > { %p3046_p3 = scmp.lt.s32.totalorder %s3037_s22, %s3037_s22 }
  0x30   : > { %p3040_p0 = pnand %p3038_p13, %p3882_p12 }
  0x31   : > { %p3047_p7 = por %p3046_p3, %p3045_p10 }
  0x32   : > { %p3041_p5 = pneg %p3040_p0 }
  0x33   : > { %2905 = dma.hbm_to_vmem [thread:$0]  (!%p3424_p11), %s3904_s4, 512, %s330_s27, [#allocation9], %s3870_s13, %s3870_s13, %s3872_s14  }
  0x34   : > { %p3048_p9 = pnand %p3047_p7, %p3041_p5 }
  0x36   : > { %3051 = shalt.err (!%p3048_p9)
}
  0x37   : > { %s3905_s5 = sld [smem:[#allocation32_spill]]  ;;  %s3453_s27 = sadd.s32 1, %s3300_s20  }
  0x38   : > { %3906 = sst [smem:[#allocation27_spill]] %s3453_s27  ;;  %s42_s12 = sadd.s32 1, %s3296_s19 }
  0x39   : > { %s39_s15 = ssub.s32 %s3300_s20, %s3453_s27  ;;  %p49_p13 = scmp.ne.s32.totalorder %s3296_s19, %s3292_s18 }
  0x3a   : > { %p40_p0 = scmp.eq.s32.totalorder %s39_s15, 0  ;;  %p50_p5 = scmp.eq.s32.totalorder %s3300_s20, 0 }
  0x3b   : > { %p3463_p10 = por %p304_p2, %p49_p13  ;;  %p2936_p3 = scmp.lt.s32.totalorder %s3300_s20, 2 }
  0x3c   : > { %s3469_s22 = scalar_select %p40_p0, %s3296_s19, %s42_s12  }
  0x3d   : > { %2908 = dma.hbm_to_vmem [thread:$0]  (!%p3424_p11), %s3905_s5, 512, %s343_s30, [#allocation12], %s3870_s13, %s3870_s13, %s3872_s14  }
  0x3e   : > { %s3907_s16 = scalar_select %p3463_p10, 1, 0 }
  0x3f   : > { %3908 = sst [smem:[#allocation28_spill]] %s3469_s22  ;;  %p51_p7 = por %p50_p5, %p49_p13 }
  0x40   : > { %s3472_s30 = sand.u32 1, %s3296_s19   ;;  %s3880_s29 = sshll.u32 %s3300_s20, 9 }
  0x41   : > { %s3879_s26 = sshll.u32 %s3472_s30, 5  ;;  %p3476_p9 = pnand %p2936_p3, %p51_p7 }
  0x42   : > { %s3883_s15 = sand.u32 1, %s3300_s20   ;;  %s3910_s1 = sld [smem:[#allocation30_spill]] }
  0x43   : > { %s416_s12 = scalar_lea.vmem [#allocation5], %s3879_s26  ;;  %s3306_s19 = smov [#allocation13]  }
  0x44   : > { %s423_s22 = sshll.u32 %s416_s12, 4  ;;  %s3492_s27 = sshll.u32 %s3306_s19, 4  ;;  %s3490_s22 = int_to_ptr.vmem [resolvable:$true] %s423_s22  ;;  %s356_s27 = int_to_ptr.vmem [resolvable:$true] %s3492_s27 }
  0x45   : > { %s3496_s24 = scalar_lea.sflag [#allocation6], %s3883_s15  ;;  %p3502_p13 = pneg %p3476_p9 }
  0x48   : > { %s3486_s5 = scalar_lea.hbm %s3910_s1, %s3880_s29  ;;  %s3057_s26 = scalar_lea.hbm %s3910_s1, 1024 }
  0x49   : > { %s3052_s17 = scalar_lea.hbm %s3486_s5, 512  ;;  %p3058_p3 = scmp.lt.s32.totalorder %s3486_s5, %s3910_s1 }
  0x4a   : > { %p3053_p2 = scmp.ne.s32.totalorder %s3486_s5, %s3052_s17  ;;  %p3059_p7 = scmp.lt.s32.totalorder %s3057_s26, %s3052_s17 }
  0x4c   : > { %p3055_p0 = pnand %p3502_p13, %p3053_p2  ;;  %p3060_p1 = por %p3059_p7, %p3058_p3 }
  0x4e   : > { %p3056_p5 = pneg %p3055_p0 }
  0x50   : > { %p3061_p12 = pnand %p3060_p1, %p3056_p5 }
  0x52   : > { %3064 = shalt.err (!%p3061_p12)
}
  0x53   : > { %s3065_s15 = scalar_lea.vmem %s3490_s22, 512  ;;  %s3307_s11 = smov [#allocation5]  }
  0x54   : > { %p3066_p6 = scmp.ne.s32.totalorder %s3490_s22, %s3065_s15  ;;  %s3070_s14 = sshll.u32 %s3307_s11, 4  ;;  %s3071_s14 = int_to_ptr.vmem [resolvable:$false] %s3070_s14 }
  0x55   : > { %s3072_s12 = scalar_lea.vmem %s3071_s14, 1024  ;;  %p3073_p10 = scmp.lt.s32.totalorder %s3490_s22, %s3071_s14 }
  0x56   : > { %p3068_p2 = pnand %p3066_p6, %p3502_p13  ;;  %p3074_p4 = scmp.lt.s32.totalorder %s3072_s12, %s3065_s15 }
  0x58   : > { %p3069_p0 = pneg %p3068_p2  ;;  %p3075_p8 = por %p3074_p4, %p3073_p10 }
  0x5a   : > { %p3076_p11 = pnand %p3075_p8, %p3069_p0 }
  0x5c   : > { %3079 = shalt.err (!%p3076_p11)
}
  0x5d   : > { %s3912_s17 = smov 8   ;;  %s3913_s26 = smov 128  }
  0x5e   : > { %2921 = dma.hbm_to_vmem [thread:$0]  (!%p3476_p9), %s3486_s5, 512, %s3490_s22, %s3496_s24, %s3913_s26, %s3913_s26, %s3912_s17  }
  0x5f   : > { %s3091_s11 = scalar_lea.vmem %s356_s27, 512  ;;  %p3914_p6 = scmp.ne.s32.totalorder %s3903_s28, 0 }
  0x60   : > { %p3092_p1 = scmp.ne.s32.totalorder %s356_s27, %s3091_s11  ;;  %p3099_p8 = scmp.lt.s32.totalorder %s356_s27, %s356_s27 }
  0x61   : > { %p3915_p12 = pneg %p3914_p6  ;;  %p3100_p11 = scmp.lt.s32.totalorder %s3091_s11, %s3091_s11 }
  0x63   : > { %p3094_p5 = pnand %p3092_p1, %p3915_p12  ;;  %p3101_p10 = por %p3100_p11, %p3099_p8 }
  0x65   : > { %p3095_p4 = pneg %p3094_p5 }
  0x67   : > { %p3102_p3 = pnand %p3101_p10, %p3095_p4 }
  0x69   : > { %3105 = shalt.err (!%p3102_p3)
}
  0x6a   : > { %s3916_s6 = sld [smem:[#allocation33_spill]]  ;;  %s3308_s5 = smov [#allocation14]  }
  0x6b   : > { %s368_s22 = sshll.u32 %s3308_s5, 4  ;;  %p3917_p2 = pmov %p3915_p12  ;;  %s369_s22 = int_to_ptr.vmem [resolvable:$true] %s368_s22 }
  0x6c   : > { %s3117_s19 = scalar_lea.vmem %s369_s22, 512  ;;  %p3125_p12 = scmp.lt.s32.totalorder %s369_s22, %s369_s22 }
  0x6d   : > { %p3118_p7 = scmp.ne.s32.totalorder %s369_s22, %s3117_s19  ;;  %p3126_p5 = scmp.lt.s32.totalorder %s3117_s19, %s3117_s19 }
  0x6f   : > { %p3120_p0 = pnand %p3118_p7, %p3917_p2  ;;  %p3127_p4 = por %p3126_p5, %p3125_p12 }
  0x70   : > { %2911 = dma.hbm_to_vmem [thread:$0]  (!%p3914_p6), %s3916_s6, 512, %s356_s27, [#allocation12], %s3913_s26, %s3913_s26, %s3912_s17  }
  0x71   : > { %p3121_p1 = pneg %p3120_p0 }
  0x73   : > { %p3128_p8 = pnand %p3127_p4, %p3121_p1 }
  0x75   : > { %3131 = shalt.err (!%p3128_p8)
}
  0x76   : > { %s3918_s7 = sld [smem:[#allocation34_spill]]  ;;  %s3919_s12 = sshll.u32 %s3300_s20, 9 }
  0x77   : > { %s3920_s0 = sld [smem:[#allocation29_spill]]  ;;  %s3921_s5 = sshll.u32 %s3472_s30, 5 }
  0x78   : > { %s395_s28 = scalar_lea.vmem [#allocation2], %s3921_s5  ;;  %s2657_s27 = sshll.u32 %s3472_s30, 3 }
  0x79   : > { %s402_s19 = sshll.u32 %s395_s28, 4  ;;  %s392_s14 = scalar_lea.sflag [#allocation3], %s3472_s30  ;;  %s3560_s19 = int_to_ptr.vmem [resolvable:$true] %s402_s19 }
  0x7c   : > { %2914 = dma.hbm_to_vmem [thread:$0]  (!%p3914_p6), %s3918_s7, 512, %s369_s22, [#allocation15], %s3913_s26, %s3913_s26, %s3912_s17  }
  0x7d   : > { %s3556_s15 = scalar_lea.hbm %s3920_s0, %s3919_s12  ;;  %s3137_s12 = scalar_lea.hbm %s3920_s0, 1024 }
  0x7e   : > { %s3132_s1 = scalar_lea.hbm %s3556_s15, 512  ;;  %p3138_p3 = scmp.lt.s32.totalorder %s3556_s15, %s3920_s0 }
  0x7f   : > { %p3133_p11 = scmp.ne.s32.totalorder %s3556_s15, %s3132_s1  ;;  %p3139_p7 = scmp.lt.s32.totalorder %s3137_s12, %s3132_s1 }
  0x81   : > { %p3135_p6 = pnand %p3133_p11, %p3502_p13  ;;  %p3140_p2 = por %p3139_p7, %p3138_p3 }
  0x83   : > { %p3136_p10 = pneg %p3135_p6 }
  0x85   : > { %p3141_p0 = pnand %p3140_p2, %p3136_p10 }
  0x87   : > { %3144 = shalt.err (!%p3141_p0)
}
  0x88   : > { %s3145_s5 = scalar_lea.vmem %s3560_s19, 512  ;;  %s3309_s28 = smov [#allocation2]  }
  0x89   : > { %p3146_p1 = scmp.ne.s32.totalorder %s3560_s19, %s3145_s5  ;;  %s3150_s6 = sshll.u32 %s3309_s28, 4  ;;  %s3151_s6 = int_to_ptr.vmem [resolvable:$false] %s3150_s6 }
  0x8a   : > { %s3152_s22 = scalar_lea.vmem %s3151_s6, 1024  ;;  %p3153_p4 = scmp.lt.s32.totalorder %s3560_s19, %s3151_s6 }
  0x8b   : > { %p3148_p12 = pnand %p3146_p1, %p3502_p13  ;;  %p3154_p8 = scmp.lt.s32.totalorder %s3152_s22, %s3145_s5 }
  0x8d   : > { %p3149_p5 = pneg %p3148_p12  ;;  %p3155_p11 = por %p3154_p8, %p3153_p4 }
  0x8f   : > { %p3156_p6 = pnand %p3155_p11, %p3149_p5 }
  0x91   : > { %3159 = shalt.err (!%p3156_p6)
}
  0x92   : > { %2918 = dma.hbm_to_vmem [thread:$0]  (!%p3476_p9), %s3556_s15, 512, %s3560_s19, %s392_s14, %s3913_s26, %s3913_s26, %s3912_s17  }
  0x93   : > { %s2658_s1 = sshll.u32 %s3300_s20, 7  ;;  %s437_s5 = scalar_lea.vmem [#allocation7], %s2657_s27 }
  0x94   : > { %s442_s29 = scalar_lea.hbm %s3860_s2, %s2658_s1  ;;  %s444_s28 = sshll.u32 %s437_s5, 4  ;;  %s445_s28 = int_to_ptr.vmem [resolvable:$true] %s444_s28 }
  0x95   : > { %s3160_s6 = scalar_lea.hbm %s442_s29, 128  ;;  %s3165_s7 = scalar_lea.hbm %s3860_s2, 256 }
  0x96   : > { %p3161_p10 = scmp.ne.s32.totalorder %s442_s29, %s3160_s6  ;;  %p3166_p2 = scmp.lt.s32.totalorder %s442_s29, %s3860_s2 }
  0x97   : > { %p3167_p0 = scmp.lt.s32.totalorder %s3165_s7, %s3160_s6 }
  0x98   : > { %p3163_p3 = pnand %p3161_p10, %p3502_p13 }
  0x99   : > { %p3168_p1 = por %p3167_p0, %p3166_p2 }
  0x9a   : > { %p3164_p7 = pneg %p3163_p3 }
  0x9c   : > { %p3169_p12 = pnand %p3168_p1, %p3164_p7 }
  0x9e   : > { %3172 = shalt.err (!%p3169_p12)
}
  0x9f   : > { %s3173_s15 = scalar_lea.vmem %s445_s28, 128  ;;  %s3310_s19 = smov [#allocation7]  }
  0xa0   : > { %p3174_p5 = scmp.ne.s32.totalorder %s445_s28, %s3173_s15  ;;  %s3178_s14 = sshll.u32 %s3310_s19, 4  ;;  %s3179_s14 = int_to_ptr.vmem [resolvable:$false] %s3178_s14 }
  0xa1   : > { %s3180_s12 = scalar_lea.vmem %s3179_s14, 256  ;;  %p3181_p11 = scmp.lt.s32.totalorder %s445_s28, %s3179_s14 }
  0xa2   : > { %p3176_p4 = pnand %p3174_p5, %p3502_p13  ;;  %p3182_p6 = scmp.lt.s32.totalorder %s3180_s12, %s3173_s15 }
  0xa4   : > { %p3177_p8 = pneg %p3176_p4  ;;  %p3183_p10 = por %p3182_p6, %p3181_p11 }
  0xa6   : > { %p3184_p3 = pnand %p3183_p10, %p3177_p8 }
  0xa8   : > { %3187 = shalt.err (!%p3184_p3)
}
  0xa9   : > { %2924 = dma.hbm_to_vmem [thread:$0]  (!%p3476_p9), %s442_s29, 128, %s445_s28, %s3496_s24  }
  0xaa   : > { %s3613_s11 = scalar_lea.hbm %s3861_s3, %s2658_s1  ;;  %s455_s5 = scalar_lea.vmem [#allocation8], %s2657_s27 }
  0xab   : > { %s462_s6 = sshll.u32 %s455_s5, 4  ;;  %s3922_s22 = sand.u32 1, %s3300_s20   ;;  %s463_s6 = int_to_ptr.vmem [resolvable:$true] %s462_s6 }
  0xac   : > { %s452_s17 = scalar_lea.sflag [#allocation9], %s3922_s22  ;;  %s3188_s26 = scalar_lea.hbm %s3613_s11, 128 }
  0xad   : > { %p3189_p7 = scmp.ne.s32.totalorder %s3613_s11, %s3188_s26  ;;  %s3193_s28 = scalar_lea.hbm %s3861_s3, 256 }
  0xae   : > { %p3194_p1 = scmp.lt.s32.totalorder %s3613_s11, %s3861_s3  ;;  %p3195_p12 = scmp.lt.s32.totalorder %s3193_s28, %s3188_s26 }
  0xaf   : > { %p3191_p2 = pnand %p3189_p7, %p3502_p13 }
  0xb0   : > { %p3196_p5 = por %p3195_p12, %p3194_p1 }
  0xb1   : > { %p3192_p0 = pneg %p3191_p2 }
  0xb3   : > { %p3197_p4 = pnand %p3196_p5, %p3192_p0 }
  0xb5   : > { %3200 = shalt.err (!%p3197_p4)
}
  0xb6   : > { %s3201_s30 = scalar_lea.vmem %s463_s6, 128  ;;  %s3311_s27 = smov [#allocation8]  }
  0xb7   : > { %p3202_p8 = scmp.ne.s32.totalorder %s463_s6, %s3201_s30  ;;  %s3206_s19 = sshll.u32 %s3311_s27, 4  ;;  %s3207_s19 = int_to_ptr.vmem [resolvable:$false] %s3206_s19 }
  0xb8   : > { %s3208_s14 = scalar_lea.vmem %s3207_s19, 256  ;;  %p3209_p10 = scmp.lt.s32.totalorder %s463_s6, %s3207_s19 }
  0xb9   : > { %p3204_p11 = pnand %p3202_p8, %p3502_p13  ;;  %p3210_p3 = scmp.lt.s32.totalorder %s3208_s14, %s3201_s30 }
  0xbb   : > { %p3205_p6 = pneg %p3204_p11  ;;  %p3211_p7 = por %p3210_p3, %p3209_p10 }
  0xbd   : > { %p3212_p2 = pnand %p3211_p7, %p3205_p6 }
  0xbf   : > { %3215 = shalt.err (!%p3212_p2)
}
  0xc0   : > { %2927 = dma.hbm_to_vmem [thread:$0]  (!%p3476_p9), %s3613_s11, 128, %s463_s6, %s452_s17  }
  0xc1   : > { %p3923_p0 = scmp.ne.s32.totalorder %s3902_s25, 0 }
  0xc2   : > { %s3638_s4 = sand.u32 (!%p3923_p0), 1, %s3292_s18   ;;  %p3924_p13 = scmp.ne.s32.totalorder (!%p3923_p0), %s3899_s23, 0 }
  0xc3   : > { %471 = sbr.rel (%p3923_p0) target bundleno = 1655 (0x677), region = 64  ;;  %s2662_s12 = sshll.u32 (!%p3923_p0), %s3638_s4, 5 }
  0xc4   : > { %s474_s0 = scalar_lea.sflag (!%p3923_p0), [#allocation3], %s3638_s4  ;;  %s3642_s7 = scalar_lea.vmem (!%p3923_p0), [#allocation2], %s2662_s12 }
  0xc8   : > { %3259 = dma.done.wait (%p3924_p13), %s474_s0, 512  }
  0xc9   : > { %3261 = vsyncadd (%p3924_p13), %s474_s0, 4294966784  ;;  %s482_s13 = sand.u32 1, %s3396_s21   ;;  %s3649_s11 = scalar_lea.vmem [#allocation5], %s2662_s12 }
  0xca   : > { %s483_s25 = scalar_lea.sflag [#allocation6], %s482_s13 }
  0xcb   : > { %3263 = dma.done.wait (%p3924_p13), %s483_s25, 640  }
  0xcc   : > { %3265 = vsyncadd (%p3924_p13), %s483_s25, 4294966656  ;;  %s3656_s5 = sshll.u32 %s3638_s4, 3  ;;  %s501_s22 = scalar_lea.sflag [#allocation9], %s482_s13 }
  0xcd   : > { %s495_s6 = scalar_lea.vmem [#allocation7], %s3656_s5  ;;  %s504_s17 = scalar_lea.vmem [#allocation8], %s3656_s5 }
  0xce   : > { %3267 = dma.done.wait (%p3924_p13), %s501_s22, 128  }
  0xcf   : > { %3269 = vsyncadd (%p3924_p13), %s501_s22, 4294967168  ;;  %p3925_p9 = scmp.eq.s32.totalorder %s3396_s21, 0 }
  0xd1   : > { %3271 = dma.done.wait (%p3925_p9), [#allocation9], 512   ;;  %p3926_p1 = pmov %p3925_p9 }
  0xd3   : > { %3273 = vsyncadd (%p3926_p1), [#allocation9], 4294966784  ;;  %p3927_p12 = pmov %p3926_p1 }
  0xd4   : > { %p3928_p5 = pmov %p3926_p1 }
  0xd5   : > { %3275 = dma.done.wait (%p3927_p12), [#allocation12], 1024  }
  0xd6   : > { %3277 = vsyncadd (%p3928_p5), [#allocation12], 4294966272  ;;  %p3929_p4 = pmov %p3926_p1 }
  0xd7   : > { %p3930_p8 = pmov %p3926_p1 }
  0xd8   : > { %3279 = dma.done.wait (%p3929_p4), [#allocation15], 512  }
  0xd9   : > { %3281 = vsyncadd (%p3930_p8), [#allocation15], 4294966784  ;;  %v3312_v0 = vmov 0.0   ;;  %vm3313_vm0 = vmmov 0   ;;  %vm586_vm1 = vcmask 64512   ;;  %v582_v1 = vld [vmem:[#allocation10] sm:$0xff] }
  0xda   : > { %2756 = vmatprep.subr.mxu0 %v3312_v0  ;;  %2761 = vmatprep.subr.mxu1 %v3312_v0  ;;  %v583_v2 = vld [vmem:[#allocation10 + $0x8] sm:$0xff]  ;;  %v574_v3 = vld [vmem:[%s3642_s7] sm:$0xff]  ;;  %v584_v5 = vld [vmem:[#allocation10 + $0x10] sm:$0xff]  ;;  %vm2407_vm3 = vcmask 261120   ;;  %s2703_s15 = sshll.u32 %s3396_s21, 7  ;;  %s573_s30 = scalar_lea.vmem [#allocation16], %s3656_s5 }
  0xdb   : > { %2758 = vmatprep.mubr.msk.f32.mxu0 %vm3313_vm0, %v3312_v0  ;;  %2763 = vmatprep.mubr.msk.f32.mxu1 %vm3313_vm0, %v3312_v0  ;;  %v575_v4 = vld [vmem:[%s3642_s7 + $0x8] sm:$0xff]  ;;  %v585_v6 = vld [vmem:[#allocation10 + $0x18] sm:$0xff]  ;;  %v576_v7 = vld [vmem:[%s3642_s7 + $0x10] sm:$0xff]  ;;  %s2470_s27 = sshll.u32 %s573_s30, 4  ;;  %s3931_s12 = sld [smem:[#allocation35_spill]]  ;;  %s2471_s27 = int_to_ptr.vmem [resolvable:$true] %s2470_s27 }
  0xdc   : > { %2757 = vmatpush3.msra.mxu0 %v582_v1  ;;  %2762 = vmatpush3.msra.mxu1 %v583_v2  ;;  %v577_v8 = vld [vmem:[%s3642_s7 + $0x18] sm:$0xff]  ;;  %v879_v9 = vld [vmem:[#allocation11] sm:$0xff]  ;;  %v880_v10 = vld [vmem:[#allocation11 + $0x8] sm:$0xff]  ;;  %s2457_s7 = scalar_lea.sflag [#allocation4], %s3638_s4  ;;  %s3216_s13 = scalar_lea.vmem %s2471_s27, 128 }
  0xdd   : > { %2759 = vmatmul.mubr.msk.f32.vlgmr.msra.gmra.mxu0 %vm586_vm1, %v574_v3  ;;  %2764 = vmatmul.mubr.msk.f32.vlgmr.msra.gmra.mxu1 %vm586_vm1, %v575_v4  ;;  %v578_v11 = vld [vmem:[%s3649_s11] sm:$0xff]  ;;  %v579_v12 = vld [vmem:[%s3649_s11 + $0x8] sm:$0xff]  ;;  %v881_v13 = vld [vmem:[#allocation11 + $0x10] sm:$0xff]  ;;  %p3217_p11 = scmp.ne.s32.totalorder %s2471_s27, %s3216_s13  ;;  %p3932_p6 = scmp.ne.s32.totalorder %s3907_s16, 0 }
  0xde   : > { %2766 = vmatprep.subr.mxu0 %v3312_v0  ;;  %2771 = vmatprep.subr.mxu1 %v3312_v0  ;;  %v882_v14 = vld [vmem:[#allocation11 + $0x18] sm:$0xff]  ;;  %v580_v15 = vld [vmem:[%s3649_s11 + $0x10] sm:$0xff]  ;;  %v1175_v17 = vld [vmem:[#allocation13] sm:$0xff]  ;;  %s3314_s25 = smov [#allocation16]  }
  0xdf   : > { %2767 = vmatpush3.msra.mxu0 %v584_v5  ;;  %2768 = vmatprep.mubr.msk.f32.mxu0 %vm3313_vm0, %v3312_v0  ;;  %v581_v16 = vld [vmem:[%s3649_s11 + $0x18] sm:$0xff]  ;;  %v1176_v18 = vld [vmem:[#allocation13 + $0x8] sm:$0xff]  ;;  %v1177_v19 = vld [vmem:[#allocation13 + $0x10] sm:$0xff]  ;;  %p3218_p10 = pnand %p3217_p11, %p3932_p6  ;;  %s3220_s11 = sshll.u32 %s3314_s25, 4  ;;  %s3221_s11 = int_to_ptr.vmem [resolvable:$false] %s3220_s11 }
  0xe0   : > { %2772 = vmatpush3.msra.mxu1 %v585_v6  ;;  %2773 = vmatprep.mubr.msk.f32.mxu1 %vm3313_vm0, %v3312_v0  ;;  %v1178_v20 = vld [vmem:[#allocation13 + $0x18] sm:$0xff]  ;;  %v1763_v45 = vld [vmem:[%s495_s6] sm:$0xff]  ;;  %s3222_s21 = scalar_lea.vmem %s3221_s11, 256  ;;  %p3223_p7 = scmp.lt.s32.totalorder %s2471_s27, %s3221_s11 }
  0xe1   : > { %2769 = vmatmul.mubr.msk.f32.vlgmr.msra.gmra.mxu0 %vm586_vm1, %v576_v7  ;;  %2774 = vmatmul.mubr.msk.f32.vlgmr.msra.gmra.mxu1 %vm586_vm1, %v577_v8  ;;  %vm1764_vm2 = vcmp.ne.s32.totalorder %v1763_v45, 0  ;;  %s2468_s0 = scalar_lea.hbm %s3931_s12, %s2703_s15  ;;  %p3219_p3 = pneg %p3218_p10 }
  0xe2   : > { %2776 = vmatprep.subr.mxu0 %v3312_v0  ;;  %2781 = vmatprep.subr.mxu1 %v3312_v0  ;;  %p3224_p2 = scmp.lt.s32.totalorder %s3222_s21, %s3216_s13 }
  0xe3   : > { %2777 = vmatpush3.msra.mxu0 %v879_v9  ;;  %2778 = vmatprep.mubr.msk.f32.mxu0 %vm3313_vm0, %v3312_v0 }
  0xe4   : > { %2782 = vmatpush3.msra.mxu1 %v880_v10  ;;  %2783 = vmatprep.mubr.msk.f32.mxu1 %vm3313_vm0, %v3312_v0  ;;  %p3225_p0 = por %p3224_p2, %p3223_p7 }
  0xe5   : > { %2779 = vmatmul.mubr.msk.f32.vlgmr.msra.gmra.mxu0 %vm586_vm1, %v578_v11  ;;  %2784 = vmatmul.mubr.msk.f32.vlgmr.msra.gmra.mxu1 %vm586_vm1, %v579_v12 }
  0xe6   : > { %2786 = vmatprep.subr.mxu0 %v3312_v0  ;;  %2791 = vmatprep.subr.mxu1 %v3312_v0  ;;  %p3226_p13 = pnand %p3225_p0, %p3219_p3 }
  0xe7   : > { %2787 = vmatpush3.msra.mxu0 %v881_v13  ;;  %2788 = vmatprep.mubr.msk.f32.mxu0 %vm3313_vm0, %v3312_v0 }
  0xe8   : > { %2792 = vmatpush3.msra.mxu1 %v882_v14  ;;  %2793 = vmatprep.mubr.msk.f32.mxu1 %vm3313_vm0, %v3312_v0 }
  0xe9   : > { %2789 = vmatmul.mubr.msk.f32.vlgmr.msra.gmra.mxu0 %vm586_vm1, %v580_v15  ;;  %2794 = vmatmul.mubr.msk.f32.vlgmr.msra.gmra.mxu1 %vm586_vm1, %v581_v16 }
  0xea   : > { %2796 = vmatprep.subr.mxu0 %v3312_v0  ;;  %2798 = vmatprep.mubr.msk.f32.mxu0 %vm3313_vm0, %v3312_v0 }
  0xeb   : > { %2801 = vmatprep.subr.mxu1 %v3312_v0  ;;  %2803 = vmatprep.mubr.msk.f32.mxu1 %vm3313_vm0, %v3312_v0 }
  0xec   : > { %2797 = vmatpush3.msra.mxu0 %v1175_v17  ;;  %2802 = vmatpush3.msra.mxu1 %v1176_v18 }
  0xed   : > { %2799 = vmatmul.mubr.msk.f32.vlgmr.msra.gmra.mxu0 %vm586_vm1, %v578_v11  ;;  %2806 = vmatprep.subr.mxu0 %v3312_v0 }
  0xee   : > { %2808 = vmatprep.mubr.msk.f32.mxu0 %vm3313_vm0, %v3312_v0  ;;  %2804 = vmatmul.mubr.msk.f32.vlgmr.msra.gmra.mxu1 %vm586_vm1, %v579_v12 }
  0xef   : > { %2811 = vmatprep.subr.mxu1 %v3312_v0  ;;  %2807 = vmatpush3.msra.mxu0 %v1177_v19 }
  0xf0   : > { %2813 = vmatprep.mubr.msk.f32.mxu1 %vm3313_vm0, %v3312_v0  ;;  %2816 = vmatprep.subr.mxu0 %v3312_v0 }
  0xf1   : > { %2809 = vmatmul.mubr.msk.f32.vlgmr.msra.gmra.mxu0 %vm586_vm1, %v580_v15  ;;  %2812 = vmatpush3.msra.mxu1 %v1178_v20 }
  0xf2   : > { %2818 = vmatprep.mubr.msk.f32.mxu0 %vm3313_vm0, %v3312_v0  ;;  %2814 = vmatmul.mubr.msk.f32.vlgmr.msra.gmra.mxu1 %vm586_vm1, %v581_v16 }
  0xf3   : > { %2821 = vmatprep.subr.mxu1 %v3312_v0  ;;  %2823 = vmatprep.mubr.msk.f32.mxu1 %vm3313_vm0, %v3312_v0 }
 0x19d   : > { %v656_v21 = vpop.f32.mrf.mxu0  ;;  %v729_v22 = vpop.f32.mrf.mxu1 }
 0x19f   : > { %v2760_v23 = vpop.f32.mrf.mxu0  ;;  %v2765_v24 = vpop.f32.mrf.mxu1 }
 0x1a1   : > { %v802_v25 = vpop.f32.mrf.mxu0  ;;  %v875_v26 = vpop.f32.mrf.mxu1 }
 0x1a3   : > { %v2770_v27 = vpop.f32.mrf.mxu0  ;;  %v2775_v28 = vpop.f32.mrf.mxu1 }
 0x1a5   : > { %v952_v29 = vpop.f32.mrf.mxu0  ;;  %v1025_v30 = vpop.f32.mrf.mxu1 }
 0x1a6   : > { %2817 = vmatpush3.xpose.msk.msra.mxu0 %vm586_vm1, %v952_v29  ;;  %2822 = vmatpush3.xpose.msk.msra.mxu1 %vm586_vm1, %v1025_v30 }
 0x1a7   : > { %v2780_v31 = vpop.f32.mrf.mxu0  ;;  %v2785_v32 = vpop.f32.mrf.mxu1  ;;  %2826 = vmatprep.subr.mxu0 %v3312_v0  ;;  %2831 = vmatprep.subr.mxu1 %v3312_v0 }
 0x1a9   : > { %v1098_v33 = vpop.f32.mrf.mxu0  ;;  %v1171_v34 = vpop.f32.mrf.mxu1  ;;  %2819 = vmatmul.mubr.msk.f32.vlgmr.msra.gmra.mxu0 %vm586_vm1, %v656_v21  ;;  %2824 = vmatmul.mubr.msk.f32.vlgmr.msra.gmra.mxu1 %vm586_vm1, %v729_v22 }
 0x1aa   : > { %2827 = vmatpush3.xpose.msk.msra.mxu0 %vm586_vm1, %v1098_v33  ;;  %2832 = vmatpush3.xpose.msk.msra.mxu1 %vm586_vm1, %v1171_v34 }
 0x1ab   : > { %v2790_v35 = vpop.f32.mrf.mxu0  ;;  %2828 = vmatprep.mubr.msk.f32.mxu0 %vm3313_vm0, %v3312_v0  ;;  %2833 = vmatprep.mubr.msk.f32.mxu1 %vm3313_vm0, %v3312_v0  ;;  %v2795_v36 = vpop.f32.mrf.mxu1 }
 0x1ac   : > { %2836 = vmatprep.subr.mxu0 %v3312_v0  ;;  %2841 = vmatprep.subr.mxu1 %v3312_v0  ;;  %v2111_v35 = vld [vmem:[#allocation14] sm:$0xff]  ;;  %v2112_v36 = vld [vmem:[#allocation14 + $0x8] sm:$0xff] }
 0x1ad   : > { %2829 = vmatmul.mubr.msk.f32.vlgmr.msra.gmra.mxu0 %vm586_vm1, %v802_v25  ;;  %2834 = vmatmul.mubr.msk.f32.vlgmr.msra.gmra.mxu1 %vm586_vm1, %v875_v26  ;;  %v1245_v37 = vpop.f32.mrf.mxu0 }
 0x1ae   : > { %2838 = vmatprep.mubr.msk.f32.mxu0 %vm3313_vm0, %v3312_v0  ;;  %2843 = vmatprep.mubr.msk.f32.mxu1 %vm3313_vm0, %v3312_v0  ;;  %v1315_v38 = vpop.f32.mrf.mxu1 }
 0x1af   : > { %2837 = vmatpush3.msra.mxu0 %v1245_v37  ;;  %v2800_v39 = vpop.f32.mrf.mxu0  ;;  %2842 = vmatpush3.msra.mxu1 %v1315_v38  ;;  %v2113_v37 = vld [vmem:[#allocation14 + $0x10] sm:$0xff] }
 0x1b0   : > { %2846 = vmatprep.subr.mxu0 %v3312_v0  ;;  %v2805_v40 = vpop.f32.mrf.mxu1  ;;  %2851 = vmatprep.subr.mxu1 %v3312_v0 }
 0x1b1   : > { %v3759_v41 = vpop.f32.mrf.mxu0  ;;  %v2114_v40 = vld [vmem:[#allocation14 + $0x18] sm:$0xff] }
 0x1b2   : > { %v3762_v42 = vpop.f32.mrf.mxu1 }
 0x1b3   : > { %v2810_v43 = vpop.f32.mrf.mxu0 }
 0x1b4   : > { %v2815_v44 = vpop.f32.mrf.mxu1 }
 0x269   : > { %v1531_v46 = vpop.f32.mrf.mxu0  ;;  %v1607_v47 = vpop.f32.mrf.mxu1 }
 0x26a   : > { %v1765_v48 = vmul.f32 0.35355338, %v1531_v46  ;;  %v1766_v49 = vmul.f32 0.35355338, %v1607_v47 }
 0x26b   : > { %v2820_v50 = vpop.f32.mrf.mxu0  ;;  %v2825_v51 = vpop.f32.mrf.mxu1 }
 0x26c   : > { %v1771_v52 = vsel %vm1764_vm2, %v1765_v48, -1e+20  ;;  %v1772_v58 = vsel %vm1764_vm2, %v1766_v49, -1e+20 }
 0x26d   : > { %v1683_v53 = vpop.f32.mrf.mxu0  ;;  %v1759_v54 = vpop.f32.mrf.mxu1  ;;  %v1775_v55 = vsel %vm586_vm1, %v1771_v52, -inf  ;;  %v1778_v62 = vsel %vm586_vm1, %v1772_v58, -inf }
 0x26e   : > { %v1767_v56 = vmul.f32 0.35355338, %v1683_v53  ;;  %v1768_v57 = vmul.f32 0.35355338, %v1759_v54  ;;  %1776 = vmax.xlane.f32.xlu0 %v1775_v55 }
 0x26f   : > { %v2830_v59 = vpop.f32.mrf.mxu0  ;;  %v2835_v60 = vpop.f32.mrf.mxu1 }
 0x270   : > { %v1773_v61 = vsel %vm1764_vm2, %v1767_v56, -1e+20  ;;  %v1774_v1 = vsel %vm1764_vm2, %v1768_v57, -1e+20  ;;  %v2699_v59 = vld [vmem:[%s3866_s8] ss:$0 sm:$0xff] }
 0x271   : > { %v1781_v63 = vsel %vm586_vm1, %v1773_v61, -inf  ;;  %v1784_v2 = vsel %vm586_vm1, %v1774_v1, -inf }
 0x272   : > { %1779 = vmax.xlane.f32.xlu0 %v1778_v62  ;;  %1782 = vmax.xlane.f32.xlu1 %v1781_v63  ;;  %v2423_v62 = vld [vmem:[%s504_s17] sm:$0xff] }
 0x276   : > { %1785 = vmax.xlane.f32.xlu1 %v1784_v2 }
 0x2f7   : > { %v1777_v3 = vpop.xlane.xlu0 %1776 }
 0x2f8   : > { %v1787_v4 = vsub.f32 %v1771_v52, %v1777_v3 }
 0x2fa   : > { %v1791_v5 = vmul.f32 1.442695, %v1787_v4 }
 0x2fb   : > { %v1780_v6 = vpop.xlane.xlu0 %1779  ;;  %v1783_v7 = vpop.xlane.xlu1 %1782 }
 0x2fc   : > { %2982 = vpow2.f32 %v1791_v5  ;;  %v1788_v8 = vsub.f32 %v1772_v58, %v1780_v6  ;;  %v1789_v9 = vsub.f32 %v1773_v61, %v1783_v7 }
 0x2fe   : > { %v1793_v10 = vmul.f32 1.442695, %v1788_v8  ;;  %v1795_v11 = vmul.f32 1.442695, %v1789_v9 }
 0x2ff   : > { %v1786_v12 = vpop.xlane.xlu1 %1785 }
 0x300   : > { %2984 = vpow2.f32 %v1793_v10  ;;  %v1790_v13 = vsub.f32 %v1774_v1, %v1786_v12  ;;  %v2700_v12 = vld [vmem:[%s3867_s9] ss:$0 sm:$0xff] }
 0x301   : > { %2986 = vpow2.f32 %v1795_v11 }
 0x302   : > { %v1797_v14 = vmul.f32 1.442695, %v1790_v13 }
 0x304   : > { %2988 = vpow2.f32 %v1797_v14  ;;  %v2701_v14 = vld [vmem:[%s3868_s10] ss:$0 sm:$0xff] }
 0x309   : > { %v2983_v15 = vpop.eup %2982 }
 0x30a   : > { %v1799_v16 = vsel %vm586_vm1, %v2983_v15, 0.0 }
 0x30b   : > { %1800 = vadd.xlane.f32.xlu0 %v1799_v16 }
 0x30d   : > { %v2985_v17 = vpop.eup %2984 }
 0x30e   : > { %v2987_v18 = vpop.eup %2986  ;;  %v1802_v19 = vsel %vm586_vm1, %v2985_v17, 0.0 }
 0x30f   : > { %1803 = vadd.xlane.f32.xlu1 %v1802_v19  ;;  %v1805_v20 = vsel %vm586_vm1, %v2987_v18, 0.0 }
 0x310   : > { %1806 = vadd.xlane.f32.xlu0 %v1805_v20 }
 0x311   : > { %v2989_v21 = vpop.eup %2988 }
 0x312   : > { %v1808_v22 = vsel %vm586_vm1, %v2989_v21, 0.0 }
 0x313   : > { %1809 = vadd.xlane.f32.xlu1 %v1808_v22 }
 0x394   : > { %v1801_v23 = vpop.xlane.xlu0 %1800 }
 0x395   : > { %2990 = vrcp.f32 %v1801_v23 }
 0x398   : > { %v1804_v24 = vpop.xlane.xlu1 %1803 }
 0x399   : > { %v1807_v25 = vpop.xlane.xlu0 %1806  ;;  %2992 = vrcp.f32 %v1804_v24 }
 0x39a   : > { %2994 = vrcp.f32 %v1807_v25 }
 0x39c   : > { %v1810_v26 = vpop.xlane.xlu1 %1809 }
 0x39d   : > { %2996 = vrcp.f32 %v1810_v26 }
 0x3a2   : > { %v2991_v27 = vpop.eup %2990 }
 0x3a3   : > { %v1815_v28 = vmul.f32 %v2991_v27, %v2983_v15 }
 0x3a5   : > { %2839 = vmatmul.mubr.msk.f32.vlgmr.msra.gmra.mxu0 %vm586_vm1, %v1815_v28 }
 0x3a6   : > { %v2993_v29 = vpop.eup %2992  ;;  %2847 = vmatpush3.msra.mxu0 %v3759_v41  ;;  %2848 = vmatprep.mubr.msk.f32.mxu0 %vm3313_vm0, %v3312_v0 }
 0x3a7   : > { %v2995_v30 = vpop.eup %2994  ;;  %v1816_v31 = vmul.f32 %v2993_v29, %v2985_v17  ;;  %2856 = vmatprep.subr.mxu0 %v3312_v0 }
 0x3a8   : > { %v1817_v32 = vmul.f32 %v2995_v30, %v2987_v18 }
 0x3a9   : > { %2844 = vmatmul.mubr.msk.f32.vlgmr.msra.gmra.mxu1 %vm586_vm1, %v1816_v31 }
 0x3aa   : > { %v2997_v33 = vpop.eup %2996  ;;  %2849 = vmatmul.mubr.msk.f32.vlgmr.msra.gmra.mxu0 %vm586_vm1, %v1817_v32  ;;  %2852 = vmatpush3.msra.mxu1 %v3762_v42 }
 0x3ab   : > { %2853 = vmatprep.mubr.msk.f32.mxu1 %vm3313_vm0, %v3312_v0  ;;  %v1818_v34 = vmul.f32 %v2997_v33, %v2989_v21  ;;  %2858 = vmatprep.mubr.msk.f32.mxu0 %vm3313_vm0, %v3312_v0 }
 0x3ac   : > { %2861 = vmatprep.subr.mxu1 %v3312_v0  ;;  %2857 = vmatpush3.msra.mxu0 %v2111_v35 }
 0x3ad   : > { %2854 = vmatmul.mubr.msk.f32.vlgmr.msra.gmra.mxu1 %vm586_vm1, %v1818_v34  ;;  %2866 = vmatprep.subr.mxu0 %v3312_v0 }
 0x3ae   : > { %2863 = vmatprep.mubr.msk.f32.mxu1 %vm3313_vm0, %v3312_v0  ;;  %2862 = vmatpush3.msra.mxu1 %v2112_v36 }
 0x3af   : > { %2871 = vmatprep.subr.mxu1 %v3312_v0 }
 0x465   : > { %v1888_v38 = vpop.f32.mrf.mxu0 }
 0x466   : > { %2859 = vmatmul.mubr.msk.f32.vlgmr.msra.gmra.mxu0 %vm586_vm1, %v1888_v38 }
 0x467   : > { %v2840_v39 = vpop.f32.mrf.mxu0  ;;  %2867 = vmatpush3.msra.mxu0 %v2113_v37  ;;  %2868 = vmatprep.mubr.msk.f32.mxu0 %vm3313_vm0, %v3312_v0 }
 0x469   : > { %v1961_v41 = vpop.f32.mrf.mxu1 }
 0x46a   : > { %v2034_v42 = vpop.f32.mrf.mxu0  ;;  %2864 = vmatmul.mubr.msk.f32.vlgmr.msra.gmra.mxu1 %vm586_vm1, %v1961_v41 }
 0x46b   : > { %2869 = vmatmul.mubr.msk.f32.vlgmr.msra.gmra.mxu0 %vm586_vm1, %v2034_v42  ;;  %v2845_v43 = vpop.f32.mrf.mxu1  ;;  %2872 = vmatpush3.msra.mxu1 %v2114_v40 }
 0x46c   : > { %v2850_v44 = vpop.f32.mrf.mxu0  ;;  %2873 = vmatprep.mubr.msk.f32.mxu1 %vm3313_vm0, %v3312_v0 }
 0x46d   : > { %v2107_v45 = vpop.f32.mrf.mxu1 }
 0x46e   : > { %2874 = vmatmul.mubr.msk.f32.vlgmr.msra.gmra.mxu1 %vm586_vm1, %v2107_v45 }
 0x46f   : > { %v2855_v46 = vpop.f32.mrf.mxu1 }
 0x526   : > { %v2184_v47 = vpop.f32.mrf.mxu0 }
 0x527   : > { %v2408_v50 = vsel %vm2407_vm3, %v2184_v47, 0.0 }
 0x528   : > { %v2860_v48 = vpop.f32.mrf.mxu0 }
 0x52a   : > { %v2257_v49 = vpop.f32.mrf.mxu1 }
 0x52b   : > { %v2409_v51 = vsel %vm2407_vm3, %v2257_v49, 0.0  ;;  %v2330_v52 = vpop.f32.mrf.mxu0 }
 0x52c   : > { %v2410_v53 = vadd.f32 %v2409_v51, %v2408_v50  ;;  %v2865_v54 = vpop.f32.mrf.mxu1  ;;  %v2411_v55 = vsel %vm2407_vm3, %v2330_v52, 0.0 }
 0x52d   : > { %v2870_v56 = vpop.f32.mrf.mxu0 }
 0x52e   : > { %v2412_v0 = vadd.f32 %v2411_v55, %v2410_v53  ;;  %v2403_v57 = vpop.f32.mrf.mxu1 }
 0x52f   : > { %v2413_v58 = vsel %vm2407_vm3, %v2403_v57, 0.0 }
 0x530   : > { %v2414_v60 = vadd.f32 %v2413_v58, %v2412_v0  ;;  %v2875_v61 = vpop.f32.mrf.mxu1 }
 0x532   : > { %v2422_v63 = vadd.f32 %v2699_v59, %v2414_v60 }
 0x534   : > { %v2424_v1 = vadd.f32 %v2423_v62, %v2422_v63 }
 0x536   : > { %v2425_v2 = vsel %vm2407_vm3, %v2424_v1, 0.0 }
 0x537   : > { %2426 = vadd.xlane.f32.xlu0 %v2425_v2 }
 0x5c0   : > { %v2427_v3 = vpop.xlane.xlu0 %2426 }
 0x5c1   : > { %v2429_v4 = vmul.f32 0.03125, %v2427_v3 }
 0x5c3   : > { %v2430_v5 = vsub.f32 %v2424_v1, %v2429_v4 }
 0x5c5   : > { %v2431_v6 = vmul.f32 %v2430_v5, %v2430_v5 }
 0x5c7   : > { %v2432_v7 = vsel %vm2407_vm3, %v2431_v6, 0.0 }
 0x5c8   : > { %2433 = vadd.xlane.f32.xlu1 %v2432_v7 }
 0x651   : > { %v2434_v8 = vpop.xlane.xlu1 %2433 }
 0x652   : > { %v2435_v9 = vmul.f32 0.03125, %v2434_v8 }
 0x654   : > { %v2436_v10 = vadd.f32 1e-05, %v2435_v9 }
 0x656   : > { %2998 = vrsqrt.f32 %v2436_v10 }
 0x663   : > { %v2999_v11 = vpop.eup %2998 }
 0x664   : > { %v2438_v13 = vmul.f32 %v2999_v11, %v2430_v5 }
 0x666   : > { %v2446_v15 = vmul.f32 %v2700_v12, %v2438_v13 }
 0x668   : > { %v2454_v16 = vadd.f32 %v2701_v14, %v2446_v15 }
 0x66a   : > { %2455 = vst.msk [vmem:[%s573_s30] sm:$0xff] %vm2407_vm3, %v2454_v16 }
 0x66b   : > { %3229 = shalt.err (!%p3226_p13)
}
 0x66c   : > { %s3230_s5 = scalar_lea.hbm %s2468_s0, 128  ;;  %s3234_s22 = scalar_lea.hbm %s3931_s12, 256 }
 0x66d   : > { %p3231_p9 = scmp.ne.s32.totalorder %s2468_s0, %s3230_s5  ;;  %p3235_p5 = scmp.lt.s32.totalorder %s2468_s0, %s3931_s12 }
 0x66e   : > { %p3236_p4 = scmp.lt.s32.totalorder %s3234_s22, %s3230_s5 }
 0x66f   : > { %p3232_p1 = pnand %p3231_p9, %p3932_p6 }
 0x670   : > { %p3237_p8 = por %p3236_p4, %p3235_p5 }
 0x671   : > { %p3233_p12 = pneg %p3232_p1 }
 0x673   : > { %p3238_p11 = pnand %p3237_p8, %p3233_p12 }
 0x675   : > { %3241 = shalt.err (!%p3238_p11)
}
 0x676   : > { %2900 = dma.vmem_to_hbm [thread:$0]  (%p3932_p6), %s2471_s27, 128, %s2468_s0, %s2457_s7  }
 0x677 PF: > { %s3933_s26 = sld [smem:[#allocation24_spill]]  ;;  %p3936_p3 = scmp.ge.s32.totalorder %s3300_s20, 2 }
 0x678   : > { %s3934_s24 = sld [smem:[#allocation26_spill]] }
 0x67d   : > { %s2482_s29 = sand.u32 1, %s3933_s26  }
 0x67e   : > { %p3935_p10 = scmp.ne.s32.totalorder %s3934_s24, 0  ;;  %s2483_s28 = scalar_lea.sflag [#allocation4], %s2482_s29 }
 0x680   : > { %p2929_p7 = pnand %p3936_p3, %p3935_p10 }
 0x682   : > { %p2930_p2 = pneg %p2929_p7 }
 0x684   : > { %3283 = dma.done.wait (%p2930_p2), %s2483_s28, 128  }
 0x685   : > { %3285 = vsyncadd (%p2930_p2), %s2483_s28, 4294967168  ;;  %s3937_s20 = sld [smem:[#allocation27_spill]]  ;;  %s3940_s17 = smov %s3292_s18 }
 0x686   : > { %s3938_s1 = sld [smem:[#allocation25_spill]] }
 0x687   : > { %s3939_s19 = sld [smem:[#allocation28_spill]] }
 0x68b   : > { %p32_p0 = scmp.ge.s32.totalorder %s3937_s20, 4  }
 0x68c   : > { %s3941_s18 = smov %s3938_s1 }
 0x68d   :  { %34 = sbr.rel (!%p32_p0) target bundleno = 19 (0x13), region = 162 }
 0x692   :  { %2488 = vsyncpa [#allocation3], 1 }
 0x693   :  { %2490 = vsyncpa [#allocation3 + $0x1], 1 }
 0x694   :  { %2491 = vsyncpa [#allocation6], 1 }
 0x695   :  { %2493 = vsyncpa [#allocation6 + $0x1], 1 }
 0x696   :  { %2494 = vsyncpa [#allocation9], 1 }
 0x697   :  { %2496 = vsyncpa [#allocation9 + $0x1], 1 }
 0x698   :  { %2497 = vsyncpa [#allocation12], 1 }
 0x699   :  { %2498 = vsyncpa [#allocation15], 1 }
 0x69a   :  { %2499 = vsyncpa [#allocation4], 1 }
 0x69b   :  { %2501 = vsyncpa [#allocation4 + $0x1], 1 }

</bundles_post_ra>
